<compile_context>
chip_gen: v6e
topology: v6e:2x2x1
jax: 0.10.0
libtpu: 0.0.40
codegen_flags: <defaults>
</compile_context>

<pallas_src>
import jax
import jax.numpy as jnp
from jax.experimental import pallas as pl
from jax.experimental.pallas import tpu as pltpu


# -----------------------------------------------------------------------------
# Small helpers
# -----------------------------------------------------------------------------
def _sublane_tile(dtype):
    """Sublane tile for the dtype: 8 (4-byte), 16 (2-byte), 32 (1-byte)."""
    itemsize = jnp.dtype(dtype).itemsize
    return max(8, 32 // itemsize)


def _round_up(a, b):
    return (a + b - 1) // b * b


def _hw_budget():
    """(target_block_bytes, vmem_limit_bytes), generation aware."""
    try:
        info = pltpu.get_tpu_info()
        vmem = getattr(info, "vmem_capacity_bytes", None)
    except Exception:  # pragma: no cover - non-TPU / query failure
        vmem = None
    if vmem is None:
        return 4 * 1024 * 1024, 32 * 1024 * 1024      # conservative fallback
    if vmem <= 64 * 1024 * 1024:
        # v7x: 64 MiB / TensorCore.  8 MiB blocks, 2x(in+out) double buffers
        # = 32 MiB, comfortably under a 48 MiB scoped limit.
        return 8 * 1024 * 1024, 48 * 1024 * 1024
    # v5e / v6e: 128 MiB physical VMEM.
    return 8 * 1024 * 1024, 64 * 1024 * 1024


def _pick_rows_per_block(n_rows, bytes_per_row, unit, target_bytes):
    """Largest multiple of `unit` whose block fits `target_bytes` (>= 1 unit),
    clipped to the unit-rounded total so tiny problems stay single-block."""
    k = max(1, target_bytes // (unit * bytes_per_row))
    rows = k * unit
    return max(unit, min(rows, _round_up(n_rows, unit)))


# -----------------------------------------------------------------------------
# drop_last=True : blocked regrouping copy (2-D lane-dense blocks).
# Only used when a Pallas entry point is explicitly requested; the default
# path is a free XLA reshape.
# -----------------------------------------------------------------------------
def _copy_kernel(x_ref, o_ref):
    o_ref[...] = x_ref[...]


def _pallas_copy_2d(x, *, rows_per_block=None):
    n_rows, d_model = x.shape
    dtype = x.dtype
    itemsize = jnp.dtype(dtype).itemsize
    sublane = _sublane_tile(dtype)
    target_bytes, vmem_limit = _hw_budget()

    rb = rows_per_block or _pick_rows_per_block(
        n_rows, d_model * itemsize, sublane, target_bytes)
    rb = max(sublane, _round_up(rb, sublane))

    nbytes = n_rows * d_model * itemsize
    return pl.pallas_call(
        _copy_kernel,
        out_shape=jax.ShapeDtypeStruct((n_rows, d_model), dtype),
        grid=(pl.cdiv(n_rows, rb),),
        in_specs=[pl.BlockSpec((rb, d_model), lambda i: (i, 0))],
        out_specs=pl.BlockSpec((rb, d_model), lambda i: (i, 0)),
        compiler_params=pltpu.CompilerParams(
            dimension_semantics=("parallel",),
            vmem_limit_bytes=vmem_limit,
        ),
        cost_estimate=pl.CostEstimate(
            flops=0, transcendentals=0, bytes_accessed=2 * nbytes),
    )(x)


# -----------------------------------------------------------------------------
# drop_last=False : zero left-pad folded into the kernel.
#
# Output row r corresponds to input row r - pad_rows (zeros for r < pad_rows).
# Each grid step i handles output rows [i*R, (i+1)*R):
#   * the current input block, rolled down by pad_rows (XLU sublane rotate),
#     provides rows r >= pad_rows,
#   * a tiny sublane-aligned tail of the previous input block (second in_spec,
#     re-read instead of carried -> grid stays "parallel") provides the head,
#   * block 0's head is zeros (the true left pad).
# -----------------------------------------------------------------------------
def _make_pad_kernel(pad_rows, rows_per_block, head_rows):
    # pltpu.roll follows jnp.roll semantics: out[r] = in[(r - shift) % n].
    body_shift = pad_rows % rows_per_block
    head_shift = pad_rows % head_rows

    def kernel(x_ref, prev_ref, o_ref):
        i = pl.program_id(0)

        x_blk = x_ref[...]                                   # (R, d_model)
        rolled = x_blk if body_shift == 0 else pltpu.roll(x_blk, body_shift, 0)
        # rolled[r] == x_blk[r - pad_rows] for r >= pad_rows  -> body is correct
        o_ref[...] = rolled

        # Head rows [0, pad_rows): previous block's tail (or zeros for i == 0).
        prev = prev_ref[...]                                 # (head_rows, d_model)
        prev_rolled = prev if head_shift == 0 else pltpu.roll(prev, head_shift, 0)
        # prev_rolled[r] == prev[head_rows - pad_rows + r] for r < pad_rows
        head_src = jnp.where(i == 0, jnp.zeros_like(prev_rolled), prev_rolled)
        row = jax.lax.broadcasted_iota(jnp.int32, (head_rows, 1), 0)
        head = jnp.where(row < pad_rows, head_src, rolled[:head_rows])
        o_ref[0:head_rows, :] = head                         # aligned, small store

    return kernel


def _pallas_left_pad_copy(x, patch_size, pad_rows, n_patches, *, rows_per_block=None):
    seq, d_model = x.shape
    dtype = x.dtype
    itemsize = jnp.dtype(dtype).itemsize
    sublane = _sublane_tile(dtype)
    target_bytes, vmem_limit = _hw_budget()

    n_out_rows = n_patches * patch_size            # == seq + pad_rows
    head_rows = _round_up(pad_rows, sublane)       # tail granularity (>= pad_rows)
    unit = head_rows                               # block rows must be a multiple

    rb = rows_per_block or _pick_rows_per_block(
        n_out_rows, d_model * itemsize, unit, target_bytes)
    assert rb % unit == 0 and rb >= unit, (rb, unit)

    k = rb // head_rows                            # head-tail blocks per main block
    nbytes = (seq + n_out_rows) * d_model * itemsize

    def prev_index(i):
        # Previous input block's last `head_rows` rows: input [i*rb - head_rows, i*rb).
        return (jnp.maximum(i * k - 1, 0), 0)

    flat = pl.pallas_call(
        _make_pad_kernel(pad_rows, rb, head_rows),
        out_shape=jax.ShapeDtypeStruct((n_out_rows, d_model), dtype),
        grid=(pl.cdiv(n_out_rows, rb),),
        in_specs=[
            pl.BlockSpec((rb, d_model), lambda i: (i, 0)),       # current block
            pl.BlockSpec((head_rows, d_model), prev_index),      # prev block tail
        ],
        out_specs=pl.BlockSpec((rb, d_model), lambda i: (i, 0)),
        compiler_params=pltpu.CompilerParams(
            dimension_semantics=("parallel",),                   # no carried state
            vmem_limit_bytes=vmem_limit,
        ),
        cost_estimate=pl.CostEstimate(
            flops=0, transcendentals=0, bytes_accessed=nbytes),
    )(x, x)
    return flat


# -----------------------------------------------------------------------------
# Wrapper (equivalent of Patch.forward).
# -----------------------------------------------------------------------------
def patch_forward(x, patch_size, drop_last=True, *, use_pallas_copy=False,
                  rows_per_block=None):
    """x: (sequence_len, d_model) -> (num_patches, patch_size, d_model)."""
    sequence_len, d_model = x.shape
    num_batch = sequence_len // patch_size

    if drop_last:
        n_patches = num_batch
        if n_patches == 0:
            return jnp.zeros((0, patch_size, d_model), x.dtype)
        n_rows = n_patches * patch_size
        x2 = x[:n_rows]                 # no-op when sequence_len % patch_size == 0
        if not use_pallas_copy:
            # Pure metadata reshape: zero HBM traffic (review's top recommendation).
            return x2.reshape(n_patches, patch_size, d_model)
        flat = _pallas_copy_2d(x2, rows_per_block=rows_per_block)
        return flat.reshape(n_patches, patch_size, d_model)

    # drop_last=False: (patch_size - sequence_len % patch_size) zero rows in front,
    # exactly as the PyTorch module (a full patch of zeros when divisible).
    pad_rows = patch_size - sequence_len % patch_size
    n_patches = num_batch + 1
    flat = _pallas_left_pad_copy(x, patch_size, pad_rows, n_patches,
                                 rows_per_block=rows_per_block)
    return flat.reshape(n_patches, patch_size, d_model)


class Patch:
    """Thin functional analog of the PyTorch module."""

    def __init__(self, d_model, sequence_len, patch_size, drop_last=True):
        self.d_model = d_model
        self.sequence_len = sequence_len
        self.patch_size = patch_size
        self.drop_last = drop_last
        self.num_batch = sequence_len // patch_size
        # TODO(synk): requires_grad_(False) has no JAX equivalent (arrays carry no grad state).

    def __call__(self, x):
        return patch_forward(x, self.patch_size, self.drop_last)

    def get_num_batch(self):
        return self.num_batch


if __name__ == "__main__":
    d_model = 128
    patch_size = 8

    key0, key1 = jax.random.split(jax.random.PRNGKey(0))

    # ---- drop_last=True -----------------------------------------------------
    seq1 = 32
    x1 = jax.random.normal(key0, (seq1, d_model), dtype=jnp.float32)
    ref1 = x1.reshape(seq1 // patch_size, patch_size, d_model)

    m = Patch(d_model, seq1, patch_size, drop_last=True)
    y1 = jax.block_until_ready(m(x1))                       # free-reshape path
    assert y1.shape == ref1.shape and jnp.array_equal(y1, ref1)

    # Pallas blocked-copy variant: default single block, then forced 4-step grid.
    y1p = jax.block_until_ready(
        patch_forward(x1, patch_size, drop_last=True, use_pallas_copy=True))
    assert jnp.array_equal(y1p, ref1)
    y1q = jax.block_until_ready(
        patch_forward(x1, patch_size, drop_last=True, use_pallas_copy=True,
                      rows_per_block=8))
    assert jnp.array_equal(y1q, ref1)

    # ---- drop_last=False (zero left-pad folded into the kernel) --------------
    seq2 = 28                          # not a multiple of patch_size -> pad 4 rows
    x2 = jax.random.normal(key1, (seq2, d_model), dtype=jnp.float32)
    pad = patch_size - seq2 % patch_size
    ref2 = jnp.concatenate(
        [jnp.zeros((pad, d_model), jnp.float32), x2], axis=0
    ).reshape(seq2 // patch_size + 1, patch_size, d_model)

    m2 = Patch(d_model, seq2, patch_size, drop_last=False)
    y2 = jax.block_until_ready(m2(x2))                      # single-block grid
    assert jnp.array_equal(y2, ref2)

    # Multi-block grid: exercises the prev-tail overlap read between blocks.
    y2b = jax.block_until_ready(
        patch_forward(x2, patch_size, drop_last=False, rows_per_block=8))
    assert jnp.array_equal(y2b, ref2)

    # Partial last output block (cdiv grid) + OOB tail of the last input block.
    y2c = jax.block_until_ready(
        patch_forward(x2, patch_size, drop_last=False, rows_per_block=24))
    assert jnp.array_equal(y2c, ref2)

    # bf16 (16-row sublane tile), sequence divisible -> full patch of zero pad.
    seq3 = 24
    x3 = jax.random.normal(key1, (seq3, d_model), dtype=jnp.float32).astype(jnp.bfloat16)
    ref3 = jnp.concatenate(
        [jnp.zeros((patch_size, d_model), jnp.bfloat16), x3], axis=0
    ).reshape(seq3 // patch_size + 1, patch_size, d_model)
    y3 = jax.block_until_ready(
        patch_forward(x3, patch_size, drop_last=False, rows_per_block=16))
    assert jnp.array_equal(y3, ref3)

    print("KERNEL_OK")
</pallas_src>

<mosaic_0001>
module attributes {stable_mosaic.version = 11 : i64} {
  func.func @_copy_kernel(%arg0: i32, %arg1: memref<32x128xf32, #tpu.memory_space<vmem>>, %arg2: memref<32x128xf32, #tpu.memory_space<vmem>>) attributes {dimension_semantics = [#tpu.dimension_semantics<parallel>], iteration_bounds = array<i64: 1>, scalar_prefetch = 0 : i64, scratch_operands = 0 : i64, tpu.core_type = #tpu.core_type<tc>, window_params = [{transform_indices = @transform_0, window_bounds = array<i64: 32, 128>}, {transform_indices = @transform_1, window_bounds = array<i64: 32, 128>}]} {
    %c0 = arith.constant 0 : index
    %c0_0 = arith.constant 0 : index
    %0 = vector.load %arg1[%c0, %c0_0] : memref<32x128xf32, #tpu.memory_space<vmem>>, vector<32x128xf32>
    %c0_1 = arith.constant 0 : index
    %c0_2 = arith.constant 0 : index
    %1 = vector.load %arg2[%c0_1, %c0_2] : memref<32x128xf32, #tpu.memory_space<vmem>>, vector<32x128xf32>
    tpu.vector_store %arg2[%c0_1, %c0_2], %0 {strides = array<i32>} : memref<32x128xf32, #tpu.memory_space<vmem>>, vector<32x128xf32>,
    return
  }
  func.func @transform_0(%arg0: i32) -> (i32, i32) {
    %c0_i32 = arith.constant 0 : i32
    %c0_i32_0 = arith.constant 0 : i32
    return %arg0, %c0_i32 : i32, i32
  }
  func.func @transform_1(%arg0: i32) -> (i32, i32) {
    %c0_i32 = arith.constant 0 : i32
    %c0_i32_0 = arith.constant 0 : i32
    return %arg0, %c0_i32 : i32, i32
  }
}

</mosaic_0001>

<bundles_post_ra>
// kernel: tpu_custom_call.1
= control target key start
LH: loop header
LB: loop body
LE: loop exit
PB: predicated region body
PF: predicated region fallthrough
CT: control target
= control target key end

     0   :  { %6 = vsyncpa [#allocation3], 0  ;;  %s116_s0 = inlined_call_operand.hbm [shape: f32[32,128], index: 0, kind: input, shape index: {}]   ;;  %s117_s1 = inlined_call_operand.hbm [shape: f32[32,128], index: 1, kind: output, shape index: {}]  }
   0x1   :  { %7 = vsyncpa [#allocation4], 0  ;;  %s96_s6 = smov [#allocation2]  }
   0x2   :  { %s13_s7 = sshll.u32 %s96_s6, 4  ;;  %s14_s7 = int_to_ptr.vmem [resolvable:$true] %s13_s7 }
   0x3   :  { %s60_s8 = scalar_lea.vmem %s14_s7, 512  ;;  %p65_p1 = scmp.lt.s32.totalorder %s14_s7, %s14_s7 }
   0x4   :  { %p61_p0 = scmp.ne.s32.totalorder %s14_s7, %s60_s8  ;;  %p66_p2 = scmp.lt.s32.totalorder %s60_s8, %s60_s8 }
   0x6   :  { %p67_p3 = por %p66_p2, %p65_p1 }
   0x8   :  { %p68_p4 = pnand %p67_p3, %p61_p0 }
   0xa   :  { %71 = shalt.err (!%p68_p4)
}
   0xb   :  { %s97_s9 = smov 128   ;;  %s98_s10 = smov 8  }
   0xc   :  { %19 = dma.hbm_to_vmem [thread:$0]  %s116_s0, 512, %s14_s7, [#allocation3], %s97_s9, %s97_s9, %s98_s10  }
   0xd   :  { %92 = dma.done.wait [#allocation3], 512  }
   0xe   :  { %93 = vsyncadd [#allocation3], 4294966784  ;;  %s99_s13 = smov [#allocation5]   ;;  %v23_v0 = vld [vmem:[#allocation2] sm:$0xff]  ;;  %v24_v1 = vld [vmem:[#allocation2 + $0x8] sm:$0xff] }
   0xf   :  { %s36_s14 = sshll.u32 %s99_s13, 4  ;;  %v25_v2 = vld [vmem:[#allocation2 + $0x10] sm:$0xff]  ;;  %27 = vst [vmem:[#allocation5] sm:$0xff] %v23_v0  ;;  %28 = vst [vmem:[#allocation5 + $0x8] sm:$0xff] %v24_v1  ;;  %v26_v3 = vld [vmem:[#allocation2 + $0x18] sm:$0xff]  ;;  %s37_s14 = int_to_ptr.vmem [resolvable:$true] %s36_s14 }
  0x10   :  { %29 = vst [vmem:[#allocation5 + $0x10] sm:$0xff] %v25_v2  ;;  %30 = vst [vmem:[#allocation5 + $0x18] sm:$0xff] %v26_v3  ;;  %s72_s15 = scalar_lea.vmem %s37_s14, 512  ;;  %p77_p6 = scmp.lt.s32.totalorder %s37_s14, %s37_s14 }
  0x11   :  { %p73_p5 = scmp.ne.s32.totalorder %s37_s14, %s72_s15  ;;  %p78_p7 = scmp.lt.s32.totalorder %s72_s15, %s72_s15 }
  0x13   :  { %p79_p8 = por %p78_p7, %p77_p6 }
  0x15   :  { %p80_p9 = pnand %p79_p8, %p73_p5 }
  0x17   :  { %83 = shalt.err (!%p80_p9)
}
  0x18   :  { %42 = dma.vmem_to_hbm [thread:$0]  %s37_s14, 512, %s117_s1, [#allocation4], %s97_s9, %s97_s9, %s98_s10  }
  0x19   :  { %94 = dma.done.wait [#allocation4], 512  }
  0x1a   :  { %95 = vsyncadd [#allocation4], 4294966784 }
  0x1b   :  { %46 = vsyncpa [#allocation3], 1 }
  0x1c   :  { %47 = vsyncpa [#allocation4], 1 }

</bundles_post_ra>
